<compile_context>
chip_gen: v5e
topology: v5e:2x2
jax: 0.10.0
libtpu: 0.0.40
codegen_flags: <defaults>
</compile_context>

<pallas_src>
import jax
import jax.numpy as jnp
from jax import lax
from jax.experimental import pallas as pl
from jax.experimental.pallas import tpu as pltpu  # noqa: F401  (kept for TPU-specific tuning hooks)

_SELU_ALPHA = 1.6732632423543772848170429916717
_SELU_SCALE = 1.0507009873554804934193349852946


# ----------------------------------------------------------------------------
# Pallas kernel: single invocation, whole problem resident in VMEM.
#   dec_ref    : (B*T, D)  decoder_input, batch folded into rows
#   enc_ref    : (B*L, E)  encoder_output, batch folded into rows
#   w_att_ref  : (E, D)    atten_weights.weight, pre-transposed
#   b_att_ref  : (1, D)
#   w_dec_ref  : (D, D)    context_out.weight[:, :D], pre-transposed
#   w_attn_ref : (L, D)    context_out.weight[:, D:], pre-transposed
#   b_ctx_ref  : (1, D)
#   out_ref    : (B*T, D)
# ----------------------------------------------------------------------------
def _make_kernel(B, T, L):
    def kernel(dec_ref, enc_ref, w_att_ref, b_att_ref,
               w_dec_ref, w_attn_ref, b_ctx_ref, out_ref):
        dec = dec_ref[...]                                  # (B*T, D)
        enc = enc_ref[...]                                  # (B*L, E)

        # Linear(E -> D) on all encoder states at once (dropout == identity, eval mode).
        proj = jnp.dot(enc, w_att_ref[...],
                       preferred_element_type=jnp.float32) + b_att_ref[...]   # (B*L, D)

        # Decoder half of context_out, batch-folded.
        out = jnp.dot(dec, w_dec_ref[...],
                      preferred_element_type=jnp.float32)                      # (B*T, D)

        # Per-batch attention scores + softmax (B is tiny & static -> unrolled).
        # dot_general contracting the last dims avoids materializing proj.T.
        dn = (((1,), (1,)), ((), ()))                       # (T, D) x (L, D) -> (T, L)
        attn_rows = []
        for b in range(B):
            dec_b = dec[b * T:(b + 1) * T, :]               # (T, D)  static, sublane-aligned
            proj_b = proj[b * L:(b + 1) * L, :]             # (L, D)
            scores = lax.dot_general(dec_b, proj_b, dn,
                                     preferred_element_type=jnp.float32)       # (T, L)
            m = jnp.max(scores, axis=-1, keepdims=True)
            e = jnp.exp(scores - m)
            denom = jnp.sum(e, axis=-1, keepdims=True)
            # EUP reciprocal (separate VLIW slot) instead of a VPU divide.
            attn_rows.append(e * pl.reciprocal(denom, approx=True))
        attn = jnp.concatenate(attn_rows, axis=0) if B > 1 else attn_rows[0]   # (B*T, L)

        # Attention half of context_out (one batch-folded matmul) + bias.
        out = out + jnp.dot(attn, w_attn_ref[...],
                            preferred_element_type=jnp.float32) + b_ctx_ref[...]

        # SELU; negative branch uses exp(min(x, 0)) - 1 so the untaken lane stays finite.
        neg = _SELU_ALPHA * (jnp.exp(jnp.minimum(out, 0.0)) - 1.0)
        out = _SELU_SCALE * jnp.where(out > 0.0, out, neg)

        out_ref[...] = out.astype(out_ref.dtype)

    return kernel


# ----------------------------------------------------------------------------
# One-time parameter prep (hoisted out of the per-call forward path).
# Torch nn.Linear layout -> x @ W layout; concat weight split into dec/attn parts.
# ----------------------------------------------------------------------------
def prepare_params(params):
    D = params["w_att"].shape[0]
    return {
        "w_att_t": jnp.transpose(params["w_att"]).astype(jnp.float32),        # (E, D)
        "b_att": params["b_att"].reshape(1, -1).astype(jnp.float32),          # (1, D)
        "w_dec_t": jnp.transpose(params["w_ctx"][:, :D]).astype(jnp.float32),  # (D, D)
        "w_attn_t": jnp.transpose(params["w_ctx"][:, D:]).astype(jnp.float32),  # (L, D)
        "b_ctx": params["b_ctx"].reshape(1, -1).astype(jnp.float32),          # (1, D)
    }


# ----------------------------------------------------------------------------
# Forward wrapper: free reshapes + a single gridless pallas_call.
# ----------------------------------------------------------------------------
def keyword_attention_forward(prep, decoder_input, encoder_output):
    B, T, D = decoder_input.shape
    _, L, E = encoder_output.shape

    dec2d = decoder_input.astype(jnp.float32).reshape(B * T, D)
    enc2d = encoder_output.astype(jnp.float32).reshape(B * L, E)

    flops = 2 * B * (L * E * D + T * D * L + T * D * D + T * L * D)
    transcendentals = B * T * (L + D)
    bytes_accessed = 4 * (2 * B * T * D + B * L * E + E * D + D * D + L * D + 2 * D)

    out2d = pl.pallas_call(
        _make_kernel(B, T, L),
        out_shape=jax.ShapeDtypeStruct((B * T, D), jnp.float32),
        cost_estimate=pl.CostEstimate(
            flops=flops,
            transcendentals=transcendentals,
            bytes_accessed=bytes_accessed),
    )(dec2d, enc2d, prep["w_att_t"], prep["b_att"],
      prep["w_dec_t"], prep["w_attn_t"], prep["b_ctx"])

    return out2d.reshape(B, T, D)


# ----------------------------------------------------------------------------
# Synthetic parameters (torch nn.Linear layouts, deterministic).
# ----------------------------------------------------------------------------
def init_params(key, encoder_len, encoder_hidden_dim, decoder_embed_hidden):
    k1, k2, k3, k4 = jax.random.split(key, 4)
    s1 = 1.0 / float(encoder_hidden_dim) ** 0.5
    s2 = 1.0 / float(encoder_len + decoder_embed_hidden) ** 0.5
    return {
        # atten_weights: Linear(encoder_hidden_dim -> decoder_embed_hidden)
        "w_att": jax.random.uniform(k1, (decoder_embed_hidden, encoder_hidden_dim),
                                    jnp.float32, -s1, s1),
        "b_att": jax.random.uniform(k2, (decoder_embed_hidden,), jnp.float32, -s1, s1),
        # context_out: Linear(encoder_len + decoder_embed_hidden -> decoder_embed_hidden)
        "w_ctx": jax.random.uniform(k3, (decoder_embed_hidden,
                                         encoder_len + decoder_embed_hidden),
                                    jnp.float32, -s2, s2),
        "b_ctx": jax.random.uniform(k4, (decoder_embed_hidden,), jnp.float32, -s2, s2),
    }


# ----------------------------------------------------------------------------
# Pure-JAX reference (literal transcription of the torch forward, eval mode).
# ----------------------------------------------------------------------------
def _ref_forward(params, decoder_input, encoder_output):
    hi = lax.Precision.HIGHEST
    context_state = encoder_output                     # dropout -> identity (eval)
    attention = (jnp.einsum("ble,de->bld", context_state, params["w_att"], precision=hi)
                 + params["b_att"])                    # (B, L, D)
    attention = jnp.swapaxes(attention, 1, 2)          # (B, D, L)
    attention_w = jnp.einsum("btd,bdl->btl", decoder_input, attention, precision=hi)
    attn = jax.nn.softmax(attention_w, axis=2)
    context_concat = jnp.concatenate([decoder_input, attn], axis=2)
    out = (jnp.einsum("btk,dk->btd", context_concat, params["w_ctx"], precision=hi)
           + params["b_ctx"])
    return jax.nn.selu(out)


if __name__ == "__main__":
    # Small shapes implied by the module.
    B, T_DEC = 2, 8
    ENCODER_LEN = 16
    ENCODER_HIDDEN_DIM = 32
    DECODER_EMBED_HIDDEN = 32

    params = init_params(jax.random.PRNGKey(42), ENCODER_LEN,
                         ENCODER_HIDDEN_DIM, DECODER_EMBED_HIDDEN)
    prep = prepare_params(params)                      # one-time weight re-layout
    jax.block_until_ready(prep)

    key = jax.random.PRNGKey(0)
    k_dec, k_enc = jax.random.split(key)
    decoder_input = jax.random.normal(
        k_dec, (B, T_DEC, DECODER_EMBED_HIDDEN), jnp.float32)
    encoder_output = jax.random.normal(
        k_enc, (B, ENCODER_LEN, ENCODER_HIDDEN_DIM), jnp.float32)

    fwd = jax.jit(keyword_attention_forward)
    out = fwd(prep, decoder_input, encoder_output)
    jax.block_until_ready(out)

    # Shape check (matches PyTorch semantics).
    assert out.shape == (B, T_DEC, DECODER_EMBED_HIDDEN)

    # Numerical check vs. pure-JAX reference of the same math.
    # Tolerance has headroom for the EUP approx-reciprocal in the softmax denom.
    ref = _ref_forward(params, decoder_input, encoder_output)
    err = float(jnp.max(jnp.abs(out - ref)))
    assert jnp.allclose(out, ref, atol=1e-3, rtol=1e-3), f"max abs err {err}"

    print("KERNEL_OK")
</pallas_src>

<mosaic_0001>
module attributes {stable_mosaic.version = 11 : i64} {
  func.func @kernel(%arg0: memref<16x32xf32, #tpu.memory_space<vmem>>, %arg1: memref<32x32xf32, #tpu.memory_space<vmem>>, %arg2: memref<32x32xf32, #tpu.memory_space<vmem>>, %arg3: memref<1x32xf32, #tpu.memory_space<vmem>>, %arg4: memref<32x32xf32, #tpu.memory_space<vmem>>, %arg5: memref<16x32xf32, #tpu.memory_space<vmem>>, %arg6: memref<1x32xf32, #tpu.memory_space<vmem>>, %arg7: memref<16x32xf32, #tpu.memory_space<vmem>>) attributes {dimension_semantics = [], scalar_prefetch = 0 : i64, scratch_operands = 0 : i64, tpu.core_type = #tpu.core_type<tc>} {
    %c0 = arith.constant 0 : index
    %c0_0 = arith.constant 0 : index
    %0 = vector.load %arg0[%c0, %c0_0] : memref<16x32xf32, #tpu.memory_space<vmem>>, vector<16x32xf32>
    %c0_1 = arith.constant 0 : index
    %c0_2 = arith.constant 0 : index
    %1 = vector.load %arg1[%c0_1, %c0_2] : memref<32x32xf32, #tpu.memory_space<vmem>>, vector<32x32xf32>
    %c0_3 = arith.constant 0 : index
    %c0_4 = arith.constant 0 : index
    %2 = vector.load %arg2[%c0_3, %c0_4] : memref<32x32xf32, #tpu.memory_space<vmem>>, vector<32x32xf32>
    %cst = arith.constant dense<0.000000e+00> : vector<32x32xf32>
    %3 = tpu.matmul %1, %2, %cst {dimension_numbers = #tpu.dot_dimension_numbers<[1], [0], [0], [1], [0, 0, 1, 1], [], []>} : vector<32x32xf32>, vector<32x32xf32>, vector<32x32xf32> -> vector<32x32xf32>
    %c0_5 = arith.constant 0 : index
    %c0_6 = arith.constant 0 : index
    %4 = vector.load %arg3[%c0_5, %c0_6] : memref<1x32xf32, #tpu.memory_space<vmem>>, vector<1x32xf32>
    %5 = vector.broadcast %4 : vector<1x32xf32> to vector<32x32xf32>
    %6 = arith.addf %3, %5 : vector<32x32xf32>
    %c0_7 = arith.constant 0 : index
    %c0_8 = arith.constant 0 : index
    %7 = vector.load %arg4[%c0_7, %c0_8] : memref<32x32xf32, #tpu.memory_space<vmem>>, vector<32x32xf32>
    %cst_9 = arith.constant dense<0.000000e+00> : vector<16x32xf32>
    %8 = tpu.matmul %0, %7, %cst_9 {dimension_numbers = #tpu.dot_dimension_numbers<[1], [0], [0], [1], [0, 0, 1, 1], [], []>} : vector<16x32xf32>, vector<32x32xf32>, vector<16x32xf32> -> vector<16x32xf32>
    %9 = vector.extract_strided_slice %0 {offsets = [0, 0], sizes = [8, 32], strides = [1, 1]} : vector<16x32xf32> to vector<8x32xf32>
    %10 = vector.extract_strided_slice %6 {offsets = [0, 0], sizes = [16, 32], strides = [1, 1]} : vector<32x32xf32> to vector<16x32xf32>
    %cst_10 = arith.constant dense<0.000000e+00> : vector<8x16xf32>
    %11 = tpu.matmul %9, %10, %cst_10 {dimension_numbers = #tpu.dot_dimension_numbers<[1], [1], [0], [0], [0, 0, 1, 0], [], []>} : vector<8x32xf32>, vector<16x32xf32>, vector<8x16xf32> -> vector<8x16xf32>
    %cst_11 = arith.constant dense<0xFF800000> : vector<8xf32>
    %12 = vector.multi_reduction <maximumf>, %11, %cst_11 [1] : vector<8x16xf32> to vector<8xf32>
    %13 = vector.shape_cast %12 : vector<8xf32> to vector<8x1xf32>
    %14 = vector.broadcast %13 : vector<8x1xf32> to vector<8x16xf32>
    %15 = arith.subf %11, %14 : vector<8x16xf32>
    %16 = math.exp %15 : vector<8x16xf32>
    %cst_12 = arith.constant dense<0.000000e+00> : vector<8xf32>
    %17 = vector.multi_reduction <add>, %16, %cst_12 [1] : vector<8x16xf32> to vector<8xf32>
    %18 = vector.shape_cast %17 : vector<8xf32> to vector<8x1xf32>
    %19 = tpu.reciprocal %18 {approx = true} : vector<8x1xf32> -> vector<8x1xf32>
    %20 = vector.broadcast %19 : vector<8x1xf32> to vector<8x16xf32>
    %21 = arith.mulf %16, %20 : vector<8x16xf32>
    %22 = vector.extract_strided_slice %0 {offsets = [8, 0], sizes = [8, 32], strides = [1, 1]} : vector<16x32xf32> to vector<8x32xf32>
    %23 = vector.extract_strided_slice %6 {offsets = [16, 0], sizes = [16, 32], strides = [1, 1]} : vector<32x32xf32> to vector<16x32xf32>
    %cst_13 = arith.constant dense<0.000000e+00> : vector<8x16xf32>
    %24 = tpu.matmul %22, %23, %cst_13 {dimension_numbers = #tpu.dot_dimension_numbers<[1], [1], [0], [0], [0, 0, 1, 0], [], []>} : vector<8x32xf32>, vector<16x32xf32>, vector<8x16xf32> -> vector<8x16xf32>
    %cst_14 = arith.constant dense<0xFF800000> : vector<8xf32>
    %25 = vector.multi_reduction <maximumf>, %24, %cst_14 [1] : vector<8x16xf32> to vector<8xf32>
    %26 = vector.shape_cast %25 : vector<8xf32> to vector<8x1xf32>
    %27 = vector.broadcast %26 : vector<8x1xf32> to vector<8x16xf32>
    %28 = arith.subf %24, %27 : vector<8x16xf32>
    %29 = math.exp %28 : vector<8x16xf32>
    %cst_15 = arith.constant dense<0.000000e+00> : vector<8xf32>
    %30 = vector.multi_reduction <add>, %29, %cst_15 [1] : vector<8x16xf32> to vector<8xf32>
    %31 = vector.shape_cast %30 : vector<8xf32> to vector<8x1xf32>
    %32 = tpu.reciprocal %31 {approx = true} : vector<8x1xf32> -> vector<8x1xf32>
    %33 = vector.broadcast %32 : vector<8x1xf32> to vector<8x16xf32>
    %34 = arith.mulf %29, %33 : vector<8x16xf32>
    %35 = tpu.concatenate %21, %34 in 0 : vector<8x16xf32>, vector<8x16xf32> -> vector<16x16xf32>
    %c0_16 = arith.constant 0 : index
    %c0_17 = arith.constant 0 : index
    %36 = vector.load %arg5[%c0_16, %c0_17] : memref<16x32xf32, #tpu.memory_space<vmem>>, vector<16x32xf32>
    %cst_18 = arith.constant dense<0.000000e+00> : vector<16x32xf32>
    %37 = tpu.matmul %35, %36, %cst_18 {dimension_numbers = #tpu.dot_dimension_numbers<[1], [0], [0], [1], [0, 0, 1, 1], [], []>} : vector<16x16xf32>, vector<16x32xf32>, vector<16x32xf32> -> vector<16x32xf32>
    %38 = arith.addf %8, %37 : vector<16x32xf32>
    %c0_19 = arith.constant 0 : index
    %c0_20 = arith.constant 0 : index
    %39 = vector.load %arg6[%c0_19, %c0_20] : memref<1x32xf32, #tpu.memory_space<vmem>>, vector<1x32xf32>
    %40 = vector.broadcast %39 : vector<1x32xf32> to vector<16x32xf32>
    %41 = arith.addf %38, %40 : vector<16x32xf32>
    %cst_21 = arith.constant 0.000000e+00 : f32
    %42 = vector.broadcast %cst_21 : f32 to vector<16x32xf32>
    %43 = arith.minimumf %41, %42 : vector<16x32xf32>
    %44 = math.exp %43 : vector<16x32xf32>
    %cst_22 = arith.constant 1.000000e+00 : f32
    %45 = vector.broadcast %cst_22 : f32 to vector<16x32xf32>
    %46 = arith.subf %44, %45 : vector<16x32xf32>
    %cst_23 = arith.constant 1.67326319 : f32
    %47 = vector.broadcast %cst_23 : f32 to vector<16x32xf32>
    %48 = arith.mulf %47, %46 : vector<16x32xf32>
    %cst_24 = arith.constant 0.000000e+00 : f32
    %49 = vector.broadcast %cst_24 : f32 to vector<16x32xf32>
    %50 = arith.cmpf ogt, %41, %49 : vector<16x32xf32>
    %51 = arith.select %50, %41, %48 : vector<16x32xi1>, vector<16x32xf32>
    %cst_25 = arith.constant 1.05070102 : f32
    %52 = vector.broadcast %cst_25 : f32 to vector<16x32xf32>
    %53 = arith.mulf %52, %51 : vector<16x32xf32>
    %c0_26 = arith.constant 0 : index
    %c0_27 = arith.constant 0 : index
    %54 = vector.load %arg7[%c0_26, %c0_27] : memref<16x32xf32, #tpu.memory_space<vmem>>, vector<16x32xf32>
    tpu.vector_store %arg7[%c0_26, %c0_27], %53 {strides = array<i32>} : memref<16x32xf32, #tpu.memory_space<vmem>>, vector<16x32xf32>,
    return
  }
}

</mosaic_0001>

<bundles_post_ra>
// kernel: keyword_attention_forward.1
= control target key start
LH: loop header
LB: loop body
LE: loop exit
PB: predicated region body
PF: predicated region fallthrough
CT: control target
= control target key end

     0   :  { %12 = vsyncpa [#allocation3], 0  ;;  %s649_s0 = inlined_call_operand.hbm [shape: f32[16,32], index: 0, kind: input, shape index: {}]   ;;  %s650_s1 = inlined_call_operand.hbm [shape: f32[32,32], index: 1, kind: input, shape index: {}]   ;;  %s651_s2 = inlined_call_operand.hbm [shape: f32[32,32], index: 2, kind: input, shape index: {}]   ;;  %s652_s3 = inlined_call_operand.vmem [shape: f32[1,32], index: 3, kind: input, shape index: {}]   ;;  %s653_s4 = inlined_call_operand.hbm [shape: f32[32,32], index: 4, kind: input, shape index: {}]   ;;  %s654_s5 = inlined_call_operand.hbm [shape: f32[16,32], index: 5, kind: input, shape index: {}]   ;;  %s655_s6 = inlined_call_operand.vmem [shape: f32[1,32], index: 6, kind: input, shape index: {}]   ;;  %s656_s7 = inlined_call_operand.hbm [shape: f32[16,32], index: 7, kind: output, shape index: {}]  }
   0x1   :  { %13 = vsyncpa [#allocation6], 0 }
   0x2   :  { %14 = vsyncpa [#allocation9], 0 }
   0x3   :  { %15 = vsyncpa [#allocation4], 0  ;;  %s33_s26 = sshll.u32 %s650_s1, 4  ;;  %s539_s27 = smov [#allocation5]   ;;  %s34_s26 = int_to_ptr.hbm [resolvable:$true] %s33_s26 }
   0x4   :  { %s35_s28 = sshll.u32 %s539_s27, 4  ;;  %s61_s8 = sshll.u32 %s653_s4, 4  ;;  %s36_s28 = int_to_ptr.vmem [resolvable:$true] %s35_s28  ;;  %s62_s8 = int_to_ptr.hbm [resolvable:$true] %s61_s8 }
   0x5   :  { %s540_s9 = smov 128   ;;  %s541_s10 = smov 8  }
   0x6   :  { %41 = dma.hbm_to_vmem [thread:$0]  %s34_s26, 512, %s36_s28, [#allocation6], %s540_s9, %s540_s9, %s541_s10  }
   0x7   :  { %s542_s11 = smov [#allocation8]   ;;  %s20_s1 = sshll.u32 %s649_s0, 4  ;;  %s21_s1 = int_to_ptr.hbm [resolvable:$true] %s20_s1 }
   0x8   :  { %s63_s12 = sshll.u32 %s542_s11, 4  ;;  %s46_s16 = sshll.u32 %s651_s2, 4  ;;  %s64_s12 = int_to_ptr.vmem [resolvable:$true] %s63_s12  ;;  %s47_s16 = int_to_ptr.hbm [resolvable:$true] %s46_s16 }
   0x9   :  { %69 = dma.hbm_to_vmem [thread:$0]  %s62_s8, 512, %s64_s12, [#allocation9], %s540_s9, %s540_s9, %s541_s10  }
   0xa   :  { %s543_s17 = smov [#allocation2]   ;;  %s544_s19 = smov [#allocation7]  }
   0xb   :  { %s22_s18 = sshll.u32 %s543_s17, 4  ;;  %s48_s0 = sshll.u32 %s544_s19, 4  ;;  %s23_s18 = int_to_ptr.vmem [resolvable:$true] %s22_s18  ;;  %s49_s0 = int_to_ptr.vmem [resolvable:$true] %s48_s0 }
   0xc   :  { %28 = dma.hbm_to_vmem [thread:$0]  %s21_s1, 256, %s23_s18, [#allocation3], %s540_s9, %s540_s9, %s541_s10  }
   0xd   :  { %s74_s22 = sshll.u32 %s654_s5, 4  ;;  %s545_s2 = smov [#allocation10]   ;;  %s75_s22 = int_to_ptr.hbm [resolvable:$true] %s74_s22 }
   0xe   :  { %54 = dma.hbm_to_vmem [thread:$0]  %s47_s16, 512, %s49_s0, [#allocation6], %s540_s9, %s540_s9, %s541_s10  }
   0xf   :  { %s76_s23 = sshll.u32 %s545_s2, 4  ;;  %s77_s23 = int_to_ptr.vmem [resolvable:$true] %s76_s23 }
  0x10   :  { %82 = dma.hbm_to_vmem [thread:$0]  %s75_s22, 256, %s77_s23, [#allocation9], %s540_s9, %s540_s9, %s541_s10  }
  0x11   :  { %531 = dma.done.wait [#allocation3], 256  }
  0x12   :  { %532 = vsyncadd [#allocation3], 4294967040 }
  0x13   :  { %533 = dma.done.wait [#allocation6], 1024  }
  0x14   :  { %534 = vsyncadd [#allocation6], 4294966272 }
  0x15   :  { %535 = dma.done.wait [#allocation9], 768  }
  0x16   :  { %536 = vsyncadd [#allocation9], 4294966528  ;;  %v114_v0 = vld [vmem:[#allocation7 + $0x18] sm:$0xff]  ;;  %v113_v1 = vld [vmem:[#allocation7 + $0x10] sm:$0xff]  ;;  %vm119_vm0 = vcmask 261120   ;;  %vm194_vm1 = vcmask 130048  }
  0x17   :  { %144 = vmatpush.msra.mxu0 %v114_v0  ;;  %361 = vmatpush.msra.mxu2 %v114_v0  ;;  %v112_v2 = vld [vmem:[#allocation7 + $0x8] sm:$0xff]  ;;  %v111_v3 = vld [vmem:[#allocation7] sm:$0xff]  ;;  %v110_v5 = vld [vmem:[#allocation5 + $0x18] sm:$0xff]  ;;  %s330_s29 = sshll.u32 %s656_s7, 4  ;;  %s331_s29 = int_to_ptr.hbm [resolvable:$true] %s330_s29 }
  0x18   :  { %v107_v4 = vld [vmem:[#allocation5] sm:$0xff]  ;;  %v108_v6 = vld [vmem:[#allocation5 + $0x8] sm:$0xff]  ;;  %v109_v7 = vld [vmem:[#allocation5 + $0x10] sm:$0xff] }
  0x19   :  { %145 = vmatpush.msra.mxu0 %v113_v1  ;;  %362 = vmatpush.msra.mxu2 %v113_v1  ;;  %v373_v9 = vld [vmem:[%s652_s3] ss:$0 sm:$0xff]  ;;  %v106_v18 = vld [vmem:[#allocation2 + $0x8] sm:$0xff]  ;;  %v247_v33 = vld [vmem:[#allocation10 + $0x8] sm:$0xff] }
  0x1a   :  { %v105_v15 = vld [vmem:[#allocation2] sm:$0xff]  ;;  %v246_v34 = vld [vmem:[#allocation10] sm:$0xff]  ;;  %v164_v35 = vld [vmem:[#allocation8 + $0x18] sm:$0xff]  ;;  %268 = vmatpush.msra.mxu3 %v247_v33 }
  0x1b   :  { %146 = vmatpush.msra.mxu0 %v112_v2  ;;  %363 = vmatpush.msra.mxu2 %v112_v2  ;;  %v163_v36 = vld [vmem:[#allocation8 + $0x10] sm:$0xff]  ;;  %v162_v37 = vld [vmem:[#allocation8 + $0x8] sm:$0xff]  ;;  %v161_v38 = vld [vmem:[#allocation8] sm:$0xff] }
  0x1c   :  { %269 = vmatpush.msra.mxu3 %v246_v34  ;;  %v374_v46 = vld [vmem:[%s655_s6] ss:$0 sm:$0xff]  ;;  %s546_s6 = smov [#allocation11]  }
  0x1d   :  { %147 = vmatpush.msra.mxu0 %v111_v3  ;;  %364 = vmatpush.msra.mxu2 %v111_v3  ;;  %s328_s26 = sshll.u32 %s546_s6, 4  ;;  %s329_s26 = int_to_ptr.vmem [resolvable:$true] %s328_s26 }
  0x1e   :  { %345 = vmatmul.msk.f32.vlgmr.msra.gmra.mxu0 %vm119_vm0, %v107_v4  ;;  %348 = vmatmul.msk.f32.vlgmr.msra.gmra.mxu2 %vm119_vm0, %v110_v5 }
  0x26   :  { %346 = vmatmul.msk.f32.gmra.mxu0 %vm119_vm0, %v108_v6 }
  0x2e   :  { %347 = vmatmul.msk.f32.gmra.mxu0 %vm119_vm0, %v109_v7 }
  0x9b   :  { %v149_v8 = vpop.f32.mrf.mxu0 }
  0x9c   :  { %v150_v14 = vadd.f32 %v373_v9, %v149_v8 }
  0xa1   :  { %v158_v10 = vpop.f32.mrf.mxu2 }
  0xa2   :  { %v159_v11 = vadd.f32 %v373_v9, %v158_v10 }
  0xa3   :  { %v152_v12 = vpop.f32.mrf.mxu0 }
  0xa4   :  { %v153_v13 = vadd.f32 %v373_v9, %v152_v12  ;;  %352 = vmatpush.xpose.msk.msrb.mxu2 %vm119_vm0, %v159_v11 }
  0xa6   :  { %349 = vmatpush.xpose.msk.msra.mxu1 %vm119_vm0, %v153_v13 }
  0xaa   :  { %350 = vmatpush.xpose.msk.msra.mxu1 %vm119_vm0, %v150_v14 }
  0xab   :  { %v155_v16 = vpop.f32.mrf.mxu0 }
  0xac   :  { %v156_v17 = vadd.f32 %v373_v9, %v155_v16 }
  0xad   :  { %351 = vmatmul.msk.f32.vlgmr.msra.gmra.mxu1 %vm119_vm0, %v105_v15 }
  0xae   :  { %353 = vmatpush.xpose.msk.msrb.mxu2 %vm119_vm0, %v156_v17  ;;  %289 = vmatpush.msrb.mxu1 %v164_v35 }
  0xb0   :  { %290 = vmatpush.msrb.mxu1 %v163_v36 }
  0xb1   :  { %354 = vmatmul.msk.f32.vlgmr.msrb.gmra.mxu2 %vm119_vm0, %v106_v18 }
  0xb2   :  { %291 = vmatpush.msrb.mxu1 %v162_v37 }
  0xb4   :  { %292 = vmatpush.msrb.mxu1 %v161_v38 }
  0xb5   :  { %357 = vmatmul.msk.f32.vlgmr.msrb.gmra.mxu1 %vm119_vm0, %v105_v15 }
  0xbd   :  { %358 = vmatmul.msk.f32.gmra.mxu1 %vm119_vm0, %v106_v18 }
 0x12a   :  { %v191_v19 = vpop.f32.mrf.mxu1 }
 0x12b   :  { %v195_v20 = vsel %vm194_vm1, %v191_v19, -inf }
 0x12c   :  { %196 = vmax.xlane.f32.xlu0 %v195_v20 }
 0x132   :  { %v294_v45 = vpop.f32.mrf.mxu1 }
 0x134   :  { %v232_v21 = vpop.f32.mrf.mxu2 }
 0x135   :  { %v235_v22 = vsel %vm194_vm1, %v232_v21, -inf }
 0x136   :  { %236 = vmax.xlane.f32.xlu0 %v235_v22 }
 0x13a   :  { %v297_v52 = vpop.f32.mrf.mxu1 }
 0x19f   :  { %v197_v23 = vpop.xlane.xlu0 %196 }
 0x1a0   :  { %v198_v24 = vsub.f32 %v191_v19, %v197_v23 }
 0x1a2   :  { %v199_v25 = vmul.f32 1.442695, %v198_v24 }
 0x1a4   :  { %375 = vpow2.f32 %v199_v25 }
 0x1a9   :  { %v237_v26 = vpop.xlane.xlu0 %236 }
 0x1aa   :  { %v376_v27 = vpop.eup %375  ;;  %v238_v28 = vsub.f32 %v232_v21, %v237_v26 }
 0x1ab   :  { %v201_v29 = vsel %vm194_vm1, %v376_v27, 0.0 }
 0x1ac   :  { %v239_v30 = vmul.f32 1.442695, %v238_v28  ;;  %202 = vadd.xlane.f32.xlu1 %v201_v29 }
 0x1ae   :  { %377 = vpow2.f32 %v239_v30 }
 0x1b4   :  { %v378_v31 = vpop.eup %377 }
 0x1b5   :  { %v241_v32 = vsel %vm194_vm1, %v378_v31, 0.0 }
 0x1b6   :  { %242 = vadd.xlane.f32.xlu1 %v241_v32 }
 0x21f   :  { %v203_v39 = vpop.xlane.xlu1 %202 }
 0x220   :  { %379 = vrcp.f32 %v203_v39 }
 0x226   :  { %v380_v40 = vpop.eup %379 }
 0x227   :  { %v205_v41 = vmul.f32 %v380_v40, %v376_v27 }
 0x229   :  { %355 = vmatmul.msk.f32.vlgmr.msra.gmra.mxu3 %vm194_vm1, %v205_v41  ;;  %v243_v42 = vpop.xlane.xlu1 %242 }
 0x22a   :  { %381 = vrcp.f32 %v243_v42 }
 0x230   :  { %v382_v43 = vpop.eup %381 }
 0x231   :  { %v245_v44 = vmul.f32 %v382_v43, %v378_v31 }
 0x233   :  { %356 = vmatmul.msk.f32.gmra.mxu3 %vm194_vm1, %v245_v44 }
 0x2ac   :  { %v271_v47 = vpop.f32.mrf.mxu3 }
 0x2ad   :  { %v295_v48 = vadd.f32 %v294_v45, %v271_v47 }
 0x2af   :  { %v304_v49 = vadd.f32 %v374_v46, %v295_v48 }
 0x2b1   :  { %v306_v50 = vmin.f32 %v304_v49, 0.0  ;;  %vm316_vm2 = vcmp.gt.f32.partialorder %v304_v49, 0.0 }
 0x2b3   :  { %v308_v51 = vmul.f32 1.442695, %v306_v50 }
 0x2b5   :  { %383 = vpow2.f32 %v308_v51 }
 0x2b6   :  { %v274_v53 = vpop.f32.mrf.mxu3 }
 0x2b7   :  { %v298_v54 = vadd.f32 %v297_v52, %v274_v53 }
 0x2b9   :  { %v305_v55 = vadd.f32 %v374_v46, %v298_v54 }
 0x2bb   :  { %v384_v56 = vpop.eup %383  ;;  %v307_v57 = vmin.f32 %v305_v55, 0.0  ;;  %vm317_vm3 = vcmp.gt.f32.partialorder %v305_v55, 0.0 }
 0x2bc   :  { %v359_v58 = vadd.f32 -1.0, %v384_v56 }
 0x2bd   :  { %v310_v59 = vmul.f32 1.442695, %v307_v57 }
 0x2be   :  { %v314_v60 = vmul.f32 1.6732632, %v359_v58 }
 0x2bf   :  { %385 = vpow2.f32 %v310_v59 }
 0x2c0   :  { %v318_v61 = vsel %vm316_vm2, %v304_v49, %v314_v60 }
 0x2c1   :  { %v320_v62 = vmul.f32 1.050701, %v318_v61 }
 0x2c3   :  { %322 = vst.msk [vmem:[#allocation11] sm:$0xff] %vm119_vm0, %v320_v62 }
 0x2c5   :  { %v386_v63 = vpop.eup %385 }
 0x2c6   :  { %v360_v0 = vadd.f32 -1.0, %v386_v63 }
 0x2c8   :  { %v315_v1 = vmul.f32 1.6732632, %v360_v0 }
 0x2ca   :  { %v319_v2 = vsel %vm317_vm3, %v305_v55, %v315_v1 }
 0x2cb   :  { %v321_v3 = vmul.f32 1.050701, %v319_v2 }
 0x2cd   :  { %323 = vst.msk [vmem:[#allocation11 + $0x8] sm:$0xff] %vm119_vm0, %v321_v3 }
 0x2ce   :  { %336 = dma.vmem_to_hbm [thread:$0]  %s329_s26, 256, %s331_s29, [#allocation4], %s540_s9, %s540_s9, %s541_s10  }
 0x2cf   :  { %537 = dma.done.wait [#allocation4], 256  }
 0x2d0   :  { %538 = vsyncadd [#allocation4], 4294967040 }
 0x2d1   :  { %341 = vsyncpa [#allocation3], 1 }
 0x2d2   :  { %342 = vsyncpa [#allocation6], 1 }
 0x2d3   :  { %343 = vsyncpa [#allocation9], 1 }
 0x2d4   :  { %344 = vsyncpa [#allocation4], 1 }

</bundles_post_ra>
